<compile_context>
chip_gen: v6e
topology: v6e:2x2x1
jax: 0.10.0
libtpu: 0.0.40
codegen_flags: <defaults>
</compile_context>

<pallas_src>
import functools

import jax
import jax.numpy as jnp
from jax.experimental import pallas as pl
from jax.experimental.pallas import tpu as pltpu

RAW_PCA_COMPONENTS = 2
IN_DIM = 25 * RAW_PCA_COMPONENTS     # 50
HID_DIM = 100
LAT_DIM = 2
XIN_ROWS = IN_DIM + LAT_DIM          # 52  (x rows 0..49, eps rows 50..51)
OUT_ROWS = IN_DIM + 2 * LAT_DIM      # 54  (recon rows 0..49, mu 50..51, logvar 52..53)

_LANE = 128
_MAX_TB = 4096                       # lanes per batch tile (keeps VMEM footprint ~11 MiB)


def _cdiv(a, b):
    return -(-a // b)


def _round_up(a, b):
    return _cdiv(a, b) * b


def _plan_batch(batch):
    """Pick (lane tile TB, num tiles) for the batch axis (= lane axis in kernel layout)."""
    b = _round_up(max(batch, 1), _LANE)
    if b <= _LANE:
        return b, 1
    # Keep >= 2 tiles when possible so the "parallel" grid axis can shard across v7x's two
    # TensorCores, and cap the tile so double-buffered I/O + intermediates fit scoped VMEM.
    n = max(2, _cdiv(b, _MAX_TB))
    tb = _round_up(_cdiv(b, n), _LANE)
    return tb, n


def _vae_kernel(xin_ref, w1_ref, b1_ref, wml_ref, bml_ref,
                w3c0_ref, w3c1_ref, b3_ref, w4_ref, b4_ref, out_ref):
    # xin: feature-major slab [52, TB]; rows 0..49 = x^T, rows 50..51 = eps^T.
    xin = xin_ref[...]

    # ---- encode: 50 -> 100, relu.  w1 is [100, 52] with zero columns for the eps rows. ----
    h1 = jnp.dot(w1_ref[...], xin, preferred_element_type=jnp.float32) + b1_ref[...]
    h1 = jnp.maximum(h1, 0.0)                                   # [100, TB]

    # ---- fused heads: one 100 -> 4 MXU pass (rows 0..1 = mu, rows 2..3 = logvar) ----
    mulv = jnp.dot(wml_ref[...], h1, preferred_element_type=jnp.float32) + bml_ref[...]  # [4, TB]
    mu = mulv[0:LAT_DIM, :]
    logvar = mulv[LAT_DIM:2 * LAT_DIM, :]

    # ---- reparameterize ----
    eps = xin[IN_DIM:IN_DIM + LAT_DIM, :]                       # [2, TB]
    z = mu + eps * jnp.exp(0.5 * logvar)                        # [2, TB]

    # ---- decode first layer: K=2 contraction as two VPU outer-product FMAs (no MXU) ----
    h3 = (w3c0_ref[...] * z[0:1, :]
          + w3c1_ref[...] * z[1:2, :]
          + b3_ref[...])                                        # [100, TB]
    h3 = jnp.maximum(h3, 0.0)

    # ---- decode second layer: 100 -> 50, sigmoid (tanh form: single EUP push) ----
    logits = jnp.dot(w4_ref[...], h3, preferred_element_type=jnp.float32) + b4_ref[...]  # [50, TB]
    recon = 0.5 * jnp.tanh(0.5 * logits) + 0.5

    # Single lane-dense store of the packed [54, TB] output slab.
    out_ref[...] = jnp.concatenate([recon, mulv], axis=0)


@functools.partial(jax.jit)
def vae_forward(x, eps, params):
    """x: [B, 50] f32 (or anything reshapeable to that), eps: [B, 2] f32.
    Returns (recon [B, 50], mu [B, 2], logvar [B, 2])."""
    x = x.reshape(-1, IN_DIM)                     # mirrors x.view(-1, 25 * raw_pca_components)
    B = x.shape[0]
    w1, b1, w21, b21, w22, b22, w3, b3, w4, b4 = params

    # Feature-major weight prep (weights are stored [in, out]; kernel wants [out, in]).
    w1e = jnp.pad(w1.T, ((0, 0), (0, LAT_DIM)))                 # [100, 52]; zero cols kill eps rows
    b1t = b1.T                                                  # [100, 1]
    wml = jnp.concatenate([w21, w22], axis=1).T                 # [4, 100]  (mu | logvar heads fused)
    bml = jnp.concatenate([b21, b22], axis=1).T                 # [4, 1]
    w3c0 = w3[0:1, :].T                                         # [100, 1]
    w3c1 = w3[1:2, :].T                                         # [100, 1]
    b3t = b3.T                                                  # [100, 1]
    w4t = w4.T                                                  # [50, 100]
    b4t = b4.T                                                  # [50, 1]
    weights = (w1e, b1t, wml, bml, w3c0, w3c1, b3t, w4t, b4t)

    TB, n_tiles = _plan_batch(B)
    B_pad = TB * n_tiles

    # Pack x and eps into a single [B, 52] slab, pad the batch, and go feature-major.
    xe = jnp.concatenate([x, eps], axis=1)                      # [B, 52]
    if B_pad != B:
        xe = jnp.pad(xe, ((0, B_pad - B), (0, 0)))
    xin = xe.T                                                  # [52, B_pad] lane-dense

    # Batch-tiled activation slab; tiny weights stay VMEM-resident (block index never changes,
    # so Pallas only DMAs them once).
    in_specs = [pl.BlockSpec((XIN_ROWS, TB), lambda i: (0, i))] + [
        pl.BlockSpec(w.shape, lambda i: (0, 0)) for w in weights
    ]
    out_specs = pl.BlockSpec((OUT_ROWS, TB), lambda i: (0, i))
    out_shape = jax.ShapeDtypeStruct((OUT_ROWS, B_pad), jnp.float32)

    flops_per_col = 2 * (IN_DIM * HID_DIM           # fc1
                         + HID_DIM * 2 * LAT_DIM    # fused fc21/fc22
                         + LAT_DIM * HID_DIM        # fc3 (VPU FMAs)
                         + HID_DIM * IN_DIM)        # fc4
    weight_elems = sum(int(w.size) for w in weights)
    cost = pl.CostEstimate(
        flops=B_pad * flops_per_col,
        transcendentals=B_pad * (LAT_DIM + IN_DIM),             # exp(0.5*logvar) + tanh(sigmoid)
        bytes_accessed=4 * B_pad * (XIN_ROWS + OUT_ROWS) + 4 * weight_elems,
    )

    out = pl.pallas_call(
        _vae_kernel,
        out_shape=out_shape,
        grid=(n_tiles,),
        in_specs=in_specs,
        out_specs=out_specs,
        compiler_params=pltpu.CompilerParams(
            dimension_semantics=("parallel",),
            # ~11 MiB actual footprint at TB=4096; 32 MiB leaves headroom and never exceeds
            # the scoped default on v6e/v7x (the previous 64 MiB was all of v7x's physical VMEM).
            vmem_limit_bytes=32 << 20,
        ),
        cost_estimate=cost,
    )(xin, *weights)

    out_t = out.T                                               # [B_pad, 54]
    recon = out_t[:B, :IN_DIM]
    mu = out_t[:B, IN_DIM:IN_DIM + LAT_DIM]
    logvar = out_t[:B, IN_DIM + LAT_DIM:OUT_ROWS]
    return recon, mu, logvar


def init_params(key):
    """Deterministic init mimicking nn.Linear default (uniform in +-1/sqrt(fan_in)).
    Weights are stored as [in, out] (transposed vs. PyTorch's [out, in])."""
    def linear(key, fan_in, fan_out):
        kw, kb = jax.random.split(key)
        bound = 1.0 / jnp.sqrt(fan_in)
        w = jax.random.uniform(kw, (fan_in, fan_out), jnp.float32, -bound, bound)
        b = jax.random.uniform(kb, (1, fan_out), jnp.float32, -bound, bound)
        return w, b

    k1, k21, k22, k3, k4 = jax.random.split(key, 5)
    w1, b1 = linear(k1, IN_DIM, HID_DIM)      # fc1:  50 -> 100
    w21, b21 = linear(k21, HID_DIM, LAT_DIM)  # fc21: 100 -> 2
    w22, b22 = linear(k22, HID_DIM, LAT_DIM)  # fc22: 100 -> 2
    w3, b3 = linear(k3, LAT_DIM, HID_DIM)     # fc3:  2 -> 100
    w4, b4 = linear(k4, HID_DIM, IN_DIM)      # fc4:  100 -> 50
    return (w1, b1, w21, b21, w22, b22, w3, b3, w4, b4)


def vae_forward_ref(x, eps, params):
    w1, b1, w21, b21, w22, b22, w3, b3, w4, b4 = params
    h1 = jnp.maximum(x @ w1 + b1, 0.0)
    mu = h1 @ w21 + b21
    logvar = h1 @ w22 + b22
    z = mu + eps * jnp.exp(0.5 * logvar)
    h3 = jnp.maximum(z @ w3 + b3, 0.0)
    recon = jax.nn.sigmoid(h3 @ w4 + b4)
    return recon, mu, logvar


def _check(B, kx, keps, params, atol=1e-4, rtol=1e-4):
    x = jax.random.normal(kx, (B, IN_DIM), jnp.float32)
    eps = jax.random.normal(keps, (B, LAT_DIM), jnp.float32)
    recon, mu, logvar = vae_forward(x, eps, params)
    jax.block_until_ready((recon, mu, logvar))
    r_ref, mu_ref, lv_ref = vae_forward_ref(x, eps, params)
    assert recon.shape == (B, IN_DIM) and mu.shape == (B, LAT_DIM) and logvar.shape == (B, LAT_DIM)
    assert jnp.allclose(recon, r_ref, atol=atol, rtol=rtol)
    assert jnp.allclose(mu, mu_ref, atol=atol, rtol=rtol)
    assert jnp.allclose(logvar, lv_ref, atol=atol, rtol=rtol)


if __name__ == "__main__":
    key = jax.random.PRNGKey(0)
    k_params, k1, k2, k3, k4, k5, k6 = jax.random.split(key, 7)
    params = init_params(k_params)

    # Input corresponds to x.view(-1, 25 * raw_pca_components); eps is the reparameterization
    # noise (torch.randn_like), supplied explicitly for determinism.
    _check(8, k1, k2, params)      # tiny batch -> single 128-lane tile (padding path)
    _check(50, k3, k4, params)     # non-multiple-of-128 batch
    _check(300, k5, k6, params)    # multi-tile grid (2 tiles) + padding

    print("KERNEL_OK")
</pallas_src>

<mosaic_0001>
module attributes {stable_mosaic.version = 11 : i64} {
  func.func @_vae_kernel(%arg0: i32, %arg1: memref<52x128xf32, #tpu.memory_space<vmem>>, %arg2: memref<100x52xf32, #tpu.memory_space<vmem>>, %arg3: memref<100x1xf32, #tpu.memory_space<vmem>>, %arg4: memref<4x100xf32, #tpu.memory_space<vmem>>, %arg5: memref<4x1xf32, #tpu.memory_space<vmem>>, %arg6: memref<100x1xf32, #tpu.memory_space<vmem>>, %arg7: memref<100x1xf32, #tpu.memory_space<vmem>>, %arg8: memref<100x1xf32, #tpu.memory_space<vmem>>, %arg9: memref<50x100xf32, #tpu.memory_space<vmem>>, %arg10: memref<50x1xf32, #tpu.memory_space<vmem>>, %arg11: memref<54x128xf32, #tpu.memory_space<vmem>>) attributes {dimension_semantics = [#tpu.dimension_semantics<parallel>], iteration_bounds = array<i64: 1>, scalar_prefetch = 0 : i64, scratch_operands = 0 : i64, tpu.core_type = #tpu.core_type<tc>, window_params = [{transform_indices = @transform_0, window_bounds = array<i64: 52, 128>}, {pipeline_mode = #tpu.pipeline_mode<synchronous>, transform_indices = @transform_1, window_bounds = array<i64: 100, 52>}, {pipeline_mode = #tpu.pipeline_mode<synchronous>, transform_indices = @transform_2, window_bounds = array<i64: 100, 1>}, {pipeline_mode = #tpu.pipeline_mode<synchronous>, transform_indices = @transform_3, window_bounds = array<i64: 4, 100>}, {pipeline_mode = #tpu.pipeline_mode<synchronous>, transform_indices = @transform_4, window_bounds = array<i64: 4, 1>}, {pipeline_mode = #tpu.pipeline_mode<synchronous>, transform_indices = @transform_5, window_bounds = array<i64: 100, 1>}, {pipeline_mode = #tpu.pipeline_mode<synchronous>, transform_indices = @transform_6, window_bounds = array<i64: 100, 1>}, {pipeline_mode = #tpu.pipeline_mode<synchronous>, transform_indices = @transform_7, window_bounds = array<i64: 100, 1>}, {pipeline_mode = #tpu.pipeline_mode<synchronous>, transform_indices = @transform_8, window_bounds = array<i64: 50, 100>}, {pipeline_mode = #tpu.pipeline_mode<synchronous>, transform_indices = @transform_9, window_bounds = array<i64: 50, 1>}, {transform_indices = @transform_10, window_bounds = array<i64: 54, 128>}]} {
    %c0 = arith.constant 0 : index
    %c0_0 = arith.constant 0 : index
    %0 = vector.load %arg1[%c0, %c0_0] : memref<52x128xf32, #tpu.memory_space<vmem>>, vector<52x128xf32>
    %c0_1 = arith.constant 0 : index
    %c0_2 = arith.constant 0 : index
    %1 = vector.load %arg2[%c0_1, %c0_2] : memref<100x52xf32, #tpu.memory_space<vmem>>, vector<100x52xf32>
    %cst = arith.constant dense<0.000000e+00> : vector<100x128xf32>
    %2 = tpu.matmul %1, %0, %cst {dimension_numbers = #tpu.dot_dimension_numbers<[1], [0], [0], [1], [0, 0, 1, 1], [], []>} : vector<100x52xf32>, vector<52x128xf32>, vector<100x128xf32> -> vector<100x128xf32>
    %c0_3 = arith.constant 0 : index
    %c0_4 = arith.constant 0 : index
    %3 = vector.load %arg3[%c0_3, %c0_4] : memref<100x1xf32, #tpu.memory_space<vmem>>, vector<100x1xf32>
    %4 = vector.broadcast %3 : vector<100x1xf32> to vector<100x128xf32>
    %5 = arith.addf %2, %4 : vector<100x128xf32>
    %cst_5 = arith.constant 0.000000e+00 : f32
    %6 = vector.broadcast %cst_5 : f32 to vector<100x128xf32>
    %7 = arith.maximumf %5, %6 : vector<100x128xf32>
    %c0_6 = arith.constant 0 : index
    %c0_7 = arith.constant 0 : index
    %8 = vector.load %arg4[%c0_6, %c0_7] : memref<4x100xf32, #tpu.memory_space<vmem>>, vector<4x100xf32>
    %cst_8 = arith.constant dense<0.000000e+00> : vector<4x128xf32>
    %9 = tpu.matmul %8, %7, %cst_8 {dimension_numbers = #tpu.dot_dimension_numbers<[1], [0], [0], [1], [0, 0, 1, 1], [], []>} : vector<4x100xf32>, vector<100x128xf32>, vector<4x128xf32> -> vector<4x128xf32>
    %c0_9 = arith.constant 0 : index
    %c0_10 = arith.constant 0 : index
    %10 = vector.load %arg5[%c0_9, %c0_10] : memref<4x1xf32, #tpu.memory_space<vmem>>, vector<4x1xf32>
    %11 = vector.broadcast %10 : vector<4x1xf32> to vector<4x128xf32>
    %12 = arith.addf %9, %11 : vector<4x128xf32>
    %13 = vector.extract_strided_slice %12 {offsets = [0, 0], sizes = [2, 128], strides = [1, 1]} : vector<4x128xf32> to vector<2x128xf32>
    %14 = vector.extract_strided_slice %12 {offsets = [2, 0], sizes = [2, 128], strides = [1, 1]} : vector<4x128xf32> to vector<2x128xf32>
    %15 = vector.extract_strided_slice %0 {offsets = [50, 0], sizes = [2, 128], strides = [1, 1]} : vector<52x128xf32> to vector<2x128xf32>
    %cst_11 = arith.constant 5.000000e-01 : f32
    %16 = vector.broadcast %cst_11 : f32 to vector<2x128xf32>
    %17 = arith.mulf %16, %14 : vector<2x128xf32>
    %18 = math.exp %17 : vector<2x128xf32>
    %19 = arith.mulf %15, %18 : vector<2x128xf32>
    %20 = arith.addf %13, %19 : vector<2x128xf32>
    %c0_12 = arith.constant 0 : index
    %c0_13 = arith.constant 0 : index
    %21 = vector.load %arg6[%c0_12, %c0_13] : memref<100x1xf32, #tpu.memory_space<vmem>>, vector<100x1xf32>
    %22 = vector.extract_strided_slice %20 {offsets = [0, 0], sizes = [1, 128], strides = [1, 1]} : vector<2x128xf32> to vector<1x128xf32>
    %23 = vector.broadcast %21 : vector<100x1xf32> to vector<100x128xf32>
    %24 = vector.broadcast %22 : vector<1x128xf32> to vector<100x128xf32>
    %25 = arith.mulf %23, %24 : vector<100x128xf32>
    %c0_14 = arith.constant 0 : index
    %c0_15 = arith.constant 0 : index
    %26 = vector.load %arg7[%c0_14, %c0_15] : memref<100x1xf32, #tpu.memory_space<vmem>>, vector<100x1xf32>
    %27 = vector.extract_strided_slice %20 {offsets = [1, 0], sizes = [1, 128], strides = [1, 1]} : vector<2x128xf32> to vector<1x128xf32>
    %28 = vector.broadcast %26 : vector<100x1xf32> to vector<100x128xf32>
    %29 = vector.broadcast %27 : vector<1x128xf32> to vector<100x128xf32>
    %30 = arith.mulf %28, %29 : vector<100x128xf32>
    %31 = arith.addf %25, %30 : vector<100x128xf32>
    %c0_16 = arith.constant 0 : index
    %c0_17 = arith.constant 0 : index
    %32 = vector.load %arg8[%c0_16, %c0_17] : memref<100x1xf32, #tpu.memory_space<vmem>>, vector<100x1xf32>
    %33 = vector.broadcast %32 : vector<100x1xf32> to vector<100x128xf32>
    %34 = arith.addf %31, %33 : vector<100x128xf32>
    %cst_18 = arith.constant 0.000000e+00 : f32
    %35 = vector.broadcast %cst_18 : f32 to vector<100x128xf32>
    %36 = arith.maximumf %34, %35 : vector<100x128xf32>
    %c0_19 = arith.constant 0 : index
    %c0_20 = arith.constant 0 : index
    %37 = vector.load %arg9[%c0_19, %c0_20] : memref<50x100xf32, #tpu.memory_space<vmem>>, vector<50x100xf32>
    %cst_21 = arith.constant dense<0.000000e+00> : vector<50x128xf32>
    %38 = tpu.matmul %37, %36, %cst_21 {dimension_numbers = #tpu.dot_dimension_numbers<[1], [0], [0], [1], [0, 0, 1, 1], [], []>} : vector<50x100xf32>, vector<100x128xf32>, vector<50x128xf32> -> vector<50x128xf32>
    %c0_22 = arith.constant 0 : index
    %c0_23 = arith.constant 0 : index
    %39 = vector.load %arg10[%c0_22, %c0_23] : memref<50x1xf32, #tpu.memory_space<vmem>>, vector<50x1xf32>
    %40 = vector.broadcast %39 : vector<50x1xf32> to vector<50x128xf32>
    %41 = arith.addf %38, %40 : vector<50x128xf32>
    %cst_24 = arith.constant 5.000000e-01 : f32
    %42 = vector.broadcast %cst_24 : f32 to vector<50x128xf32>
    %43 = arith.mulf %42, %41 : vector<50x128xf32>
    %44 = math.tanh %43 : vector<50x128xf32>
    %cst_25 = arith.constant 5.000000e-01 : f32
    %45 = vector.broadcast %cst_25 : f32 to vector<50x128xf32>
    %46 = arith.mulf %45, %44 : vector<50x128xf32>
    %cst_26 = arith.constant 5.000000e-01 : f32
    %47 = vector.broadcast %cst_26 : f32 to vector<50x128xf32>
    %48 = arith.addf %46, %47 : vector<50x128xf32>
    %49 = tpu.concatenate %48, %12 in 0 : vector<50x128xf32>, vector<4x128xf32> -> vector<54x128xf32>
    %c0_27 = arith.constant 0 : index
    %c0_28 = arith.constant 0 : index
    %50 = vector.load %arg11[%c0_27, %c0_28] : memref<54x128xf32, #tpu.memory_space<vmem>>, vector<54x128xf32>
    tpu.vector_store %arg11[%c0_27, %c0_28], %49 {strides = array<i32>} : memref<54x128xf32, #tpu.memory_space<vmem>>, vector<54x128xf32>,
    return
  }
  func.func @transform_0(%arg0: i32) -> (i32, i32) {
    %c0_i32 = arith.constant 0 : i32
    %c0_i32_0 = arith.constant 0 : i32
    return %c0_i32, %arg0 : i32, i32
  }
  func.func @transform_1(%arg0: i32) -> (i32, i32) {
    %c0_i32 = arith.constant 0 : i32
    %c0_i32_0 = arith.constant 0 : i32
    %c0_i32_1 = arith.constant 0 : i32
    return %c0_i32, %c0_i32_0 : i32, i32
  }
  func.func @transform_2(%arg0: i32) -> (i32, i32) {
    %c0_i32 = arith.constant 0 : i32
    %c0_i32_0 = arith.constant 0 : i32
    %c0_i32_1 = arith.constant 0 : i32
    return %c0_i32, %c0_i32_0 : i32, i32
  }
  func.func @transform_3(%arg0: i32) -> (i32, i32) {
    %c0_i32 = arith.constant 0 : i32
    %c0_i32_0 = arith.constant 0 : i32
    %c0_i32_1 = arith.constant 0 : i32
    return %c0_i32, %c0_i32_0 : i32, i32
  }
  func.func @transform_4(%arg0: i32) -> (i32, i32) {
    %c0_i32 = arith.constant 0 : i32
    %c0_i32_0 = arith.constant 0 : i32
    %c0_i32_1 = arith.constant 0 : i32
    return %c0_i32, %c0_i32_0 : i32, i32
  }
  func.func @transform_5(%arg0: i32) -> (i32, i32) {
    %c0_i32 = arith.constant 0 : i32
    %c0_i32_0 = arith.constant 0 : i32
    %c0_i32_1 = arith.constant 0 : i32
    return %c0_i32, %c0_i32_0 : i32, i32
  }
  func.func @transform_6(%arg0: i32) -> (i32, i32) {
    %c0_i32 = arith.constant 0 : i32
    %c0_i32_0 = arith.constant 0 : i32
    %c0_i32_1 = arith.constant 0 : i32
    return %c0_i32, %c0_i32_0 : i32, i32
  }
  func.func @transform_7(%arg0: i32) -> (i32, i32) {
    %c0_i32 = arith.constant 0 : i32
    %c0_i32_0 = arith.constant 0 : i32
    %c0_i32_1 = arith.constant 0 : i32
    return %c0_i32, %c0_i32_0 : i32, i32
  }
  func.func @transform_8(%arg0: i32) -> (i32, i32) {
    %c0_i32 = arith.constant 0 : i32
    %c0_i32_0 = arith.constant 0 : i32
    %c0_i32_1 = arith.constant 0 : i32
    return %c0_i32, %c0_i32_0 : i32, i32
  }
  func.func @transform_9(%arg0: i32) -> (i32, i32) {
    %c0_i32 = arith.constant 0 : i32
    %c0_i32_0 = arith.constant 0 : i32
    %c0_i32_1 = arith.constant 0 : i32
    return %c0_i32, %c0_i32_0 : i32, i32
  }
  func.func @transform_10(%arg0: i32) -> (i32, i32) {
    %c0_i32 = arith.constant 0 : i32
    %c0_i32_0 = arith.constant 0 : i32
    return %c0_i32, %arg0 : i32, i32
  }
}

</mosaic_0001>

<bundles_post_ra>
// kernel: vae_forward.1
= control target key start
LH: loop header
LB: loop body
LE: loop exit
PB: predicated region body
PF: predicated region fallthrough
CT: control target
= control target key end

     0   :  { %v1178_v0 = vmov 0.0   ;;  %vm173_vm0 = vcmask 1043456   ;;  %v1179_v4 = vmov 0   ;;  %vm1180_vm1 = vmmov 0   ;;  %s1683_s2 = inlined_call_operand.vmem [shape: f32[100,1], index: 2, kind: input, shape index: {}]   ;;  %s1684_s0 = inlined_call_operand.vmem [shape: f32[52,128], index: 0, kind: input, shape index: {}]   ;;  %s1685_s1 = inlined_call_operand.vmem [shape: f32[100,52], index: 1, kind: input, shape index: {}]   ;;  %s1686_s4 = inlined_call_operand.vmem [shape: f32[4,1], index: 4, kind: input, shape index: {}]   ;;  %s1687_s6 = inlined_call_operand.vmem [shape: f32[100,1], index: 6, kind: input, shape index: {}]   ;;  %s1688_s5 = inlined_call_operand.vmem [shape: f32[100,1], index: 5, kind: input, shape index: {}]   ;;  %s1689_s7 = inlined_call_operand.vmem [shape: f32[100,1], index: 7, kind: input, shape index: {}]   ;;  %s1690_s9 = inlined_call_operand.vmem [shape: f32[50,1], index: 9, kind: input, shape index: {}]   ;;  %s1691_s3 = inlined_call_operand.vmem [shape: f32[4,100], index: 3, kind: input, shape index: {}]   ;;  %s1692_s8 = inlined_call_operand.vmem [shape: f32[50,100], index: 8, kind: input, shape index: {}]   ;;  %s1693_s10 = inlined_call_operand.vmem [shape: f32[54,128], index: 10, kind: output, shape index: {}]  }
   0x1   :  { %1014 = vmatprep.subr.mxu0 %v1178_v0  ;;  %1143 = vmatprep.subr.mxu1 %v1178_v0  ;;  %v67_v1 = vld [vmem:[%s1683_s2 + $0x60] sm:$0xf]  ;;  %v65_v2 = vld [vmem:[%s1683_s2 + $0x50] sm:$0xff]  ;;  %v40_v5 = vld [vmem:[%s1684_s0 + $0x28] sm:$0xff]  ;;  %vm133_vm2 = vcmask 424960   ;;  %vm327_vm3 = vcmask 818176  }
   0x2   :  { %v1247_v3 = vld [vmem:[%s1684_s0 + $0x30] sm:$0xf]  ;;  %1161 = vset.pattern.permute.xlu1 %v1179_v4  ;;  %1160 = vset.pattern.permute.xlu0 %v1179_v4  ;;  %v66_v6 = vld [vmem:[%s1683_s2 + $0x58] sm:$0xff]  ;;  %v64_v7 = vld [vmem:[%s1683_s2 + $0x48] sm:$0xff]  ;;  %vm923_vm4 = vcmask 1041408  }
   0x3   :  { %130 = vperm.xlu0 %1160, %v67_v1   ;;  %120 = vperm.xlu1 %1161, %v65_v2   ;;  %v39_v8 = vld [vmem:[%s1684_s0 + $0x20] sm:$0xff]  ;;  %v38_v9 = vld [vmem:[%s1684_s0 + $0x18] sm:$0xff]  ;;  %v37_v12 = vld [vmem:[%s1684_s0 + $0x10] sm:$0xff] }
   0x4   :  { %1015 = vmatpush3.msk.msra.mxu0 %vm173_vm0, %v1247_v3  ;;  %1150 = vmatpush3.msk.msra.mxu1 %vm173_vm0, %v1247_v3  ;;  %v63_v10 = vld [vmem:[%s1683_s2 + $0x40] sm:$0xff]  ;;  %v62_v11 = vld [vmem:[%s1683_s2 + $0x38] sm:$0xff]  ;;  %v36_v13 = vld [vmem:[%s1684_s0 + $0x8] sm:$0xff] }
   0x5   :  { %1016 = vmatprep.subr.mxu0 %v1178_v0  ;;  %1144 = vmatprep.subr.mxu1 %v1178_v0  ;;  %v61_v14 = vld [vmem:[%s1683_s2 + $0x30] sm:$0xff]  ;;  %v60_v15 = vld [vmem:[%s1683_s2 + $0x28] sm:$0xff]  ;;  %v35_v16 = vld [vmem:[%s1684_s0] sm:$0xff] }
   0x6   :  { %1017 = vmatpush3.msra.mxu0 %v40_v5  ;;  %1151 = vmatpush3.msra.mxu1 %v40_v5  ;;  %v42_v17 = vld [vmem:[%s1685_s1] sm:$0xff]  ;;  %v49_v18 = vld [vmem:[%s1685_s1 + $0x38] sm:$0xff]  ;;  %v43_v21 = vld [vmem:[%s1685_s1 + $0x8] sm:$0xff] }
   0x7   :  { %1018 = vmatprep.subr.mxu0 %v1178_v0  ;;  %1145 = vmatprep.subr.mxu1 %v1178_v0  ;;  %v59_v19 = vld [vmem:[%s1683_s2 + $0x20] sm:$0xff]  ;;  %v58_v20 = vld [vmem:[%s1683_s2 + $0x18] sm:$0xff]  ;;  %v57_v23 = vld [vmem:[%s1683_s2 + $0x10] sm:$0xff] }
   0x8   :  { %125 = vperm.xlu0 %1160, %v66_v6   ;;  %115 = vperm.xlu1 %1161, %v64_v7   ;;  %v50_v22 = vld [vmem:[%s1685_s1 + $0x40] sm:$0xff]  ;;  %v56_v24 = vld [vmem:[%s1683_s2 + $0x8] sm:$0xff]  ;;  %v44_v25 = vld [vmem:[%s1685_s1 + $0x10] sm:$0xff] }
   0x9   :  { %1019 = vmatpush3.msra.mxu0 %v39_v8  ;;  %1152 = vmatpush3.msra.mxu1 %v39_v8  ;;  %v51_v26 = vld [vmem:[%s1685_s1 + $0x48] sm:$0xff]  ;;  %v321_v27 = vld [vmem:[%s1686_s4] sm:$0xf]  ;;  %v45_v29 = vld [vmem:[%s1685_s1 + $0x18] sm:$0xff] }
   0xa   :  { %1020 = vmatprep.subr.mxu0 %v1178_v0  ;;  %1146 = vmatprep.subr.mxu1 %v1178_v0  ;;  %v55_v28 = vld [vmem:[%s1683_s2] sm:$0xff]  ;;  %v52_v30 = vld [vmem:[%s1685_s1 + $0x50] sm:$0xff]  ;;  %v53_v34 = vld [vmem:[%s1685_s1 + $0x58] sm:$0xff] }
   0xb   :  { %1021 = vmatpush3.msra.mxu0 %v38_v9  ;;  %1153 = vmatpush3.msra.mxu1 %v38_v9  ;;  %v519_v31 = vld [vmem:[%s1687_s6 + $0x60] sm:$0xf]  ;;  %v518_v35 = vld [vmem:[%s1687_s6 + $0x58] sm:$0xff]  ;;  %v47_v37 = vld [vmem:[%s1685_s1 + $0x28] sm:$0xff] }
   0xc   :  { %1022 = vmatprep.subr.mxu0 %v1178_v0  ;;  %1147 = vmatprep.subr.mxu1 %v1178_v0  ;;  %v424_v32 = vld [vmem:[%s1688_s5 + $0x60] sm:$0xf]  ;;  %v423_v36 = vld [vmem:[%s1688_s5 + $0x58] sm:$0xff]  ;;  %v517_v39 = vld [vmem:[%s1687_s6 + $0x50] sm:$0xff] }
   0xd   :  { %110 = vperm.xlu0 %1160, %v63_v10   ;;  %105 = vperm.xlu1 %1161, %v62_v11   ;;  %v46_v33 = vld [vmem:[%s1685_s1 + $0x20] sm:$0xff]  ;;  %v422_v40 = vld [vmem:[%s1688_s5 + $0x50] sm:$0xff]  ;;  %v421_v42 = vld [vmem:[%s1688_s5 + $0x48] sm:$0xff] }
   0xe   :  { %1023 = vmatpush3.msra.mxu0 %v37_v12  ;;  %1154 = vmatpush3.msra.mxu1 %v37_v12  ;;  %v54_v38 = vld [vmem:[%s1685_s1 + $0x60] sm:$0xf]  ;;  %v48_v41 = vld [vmem:[%s1685_s1 + $0x30] sm:$0xff]  ;;  %v626_v44 = vld [vmem:[%s1689_s7 + $0x58] sm:$0xff] }
   0xf   :  { %1024 = vmatprep.subr.mxu0 %v1178_v0  ;;  %1148 = vmatprep.subr.mxu1 %v1178_v0  ;;  %v627_v43 = vld [vmem:[%s1689_s7 + $0x60] sm:$0xf]  ;;  %v516_v45 = vld [vmem:[%s1687_s6 + $0x48] sm:$0xff]  ;;  %v419_v48 = vld [vmem:[%s1688_s5 + $0x38] sm:$0xff] }
  0x10   :  { %1025 = vmatpush3.msra.mxu0 %v36_v13  ;;  %1155 = vmatpush3.msra.mxu1 %v36_v13  ;;  %v515_v46 = vld [vmem:[%s1687_s6 + $0x40] sm:$0xff]  ;;  %v625_v49 = vld [vmem:[%s1689_s7 + $0x50] sm:$0xff]  ;;  %v624_v50 = vld [vmem:[%s1689_s7 + $0x48] sm:$0xff] }
  0x11   :  { %1026 = vmatprep.subr.mxu0 %v1178_v0  ;;  %1149 = vmatprep.subr.mxu1 %v1178_v0  ;;  %v420_v47 = vld [vmem:[%s1688_s5 + $0x40] sm:$0xff]  ;;  %v514_v51 = vld [vmem:[%s1687_s6 + $0x38] sm:$0xff]  ;;  %v513_v52 = vld [vmem:[%s1687_s6 + $0x30] sm:$0xff] }
  0x12   :  { %1028 = vmatprep.mubr.msk.f32.mxu0 %vm1180_vm1, %v1178_v0  ;;  %1049 = vmatprep.mubr.msk.f32.mxu1 %vm1180_vm1, %v1178_v0  ;;  %v418_v53 = vld [vmem:[%s1688_s5 + $0x30] sm:$0xff]  ;;  %v417_v54 = vld [vmem:[%s1688_s5 + $0x28] sm:$0xff]  ;;  %v623_v55 = vld [vmem:[%s1689_s7 + $0x40] sm:$0xff] }
  0x13   :  { %100 = vperm.xlu0 %1160, %v61_v14   ;;  %95 = vperm.xlu1 %1161, %v60_v15   ;;  %v622_v56 = vld [vmem:[%s1689_s7 + $0x38] sm:$0xff]  ;;  %v512_v57 = vld [vmem:[%s1687_s6 + $0x28] sm:$0xff]  ;;  %v511_v58 = vld [vmem:[%s1687_s6 + $0x20] sm:$0xff] }
  0x14   :  { %1027 = vmatpush3.msra.mxu0 %v35_v16  ;;  %1156 = vmatpush3.msra.mxu1 %v35_v16  ;;  %v416_v59 = vld [vmem:[%s1688_s5 + $0x20] sm:$0xff]  ;;  %v415_v60 = vld [vmem:[%s1688_s5 + $0x18] sm:$0xff]  ;;  %v621_v61 = vld [vmem:[%s1689_s7 + $0x30] sm:$0xff] }
  0x15   :  { %1029 = vmatmul.mubr.msk.f32.vlgmr.msra.gmra.mxu0 %vm133_vm2, %v42_v17  ;;  %1050 = vmatmul.mubr.msk.f32.vlgmr.msra.gmra.mxu1 %vm133_vm2, %v49_v18  ;;  %v620_v62 = vld [vmem:[%s1689_s7 + $0x28] sm:$0xff]  ;;  %v510_v63 = vld [vmem:[%s1687_s6 + $0x18] sm:$0xff]  ;;  %v509_v1 = vld [vmem:[%s1687_s6 + $0x10] sm:$0xff] }
  0x16   :  { %1031 = vmatprep.mubr.msk.f32.mxu0 %vm1180_vm1, %v1178_v0  ;;  %1052 = vmatprep.mubr.msk.f32.mxu1 %vm1180_vm1, %v1178_v0  ;;  %v414_v2 = vld [vmem:[%s1688_s5 + $0x10] sm:$0xff]  ;;  %v413_v4 = vld [vmem:[%s1688_s5 + $0x8] sm:$0xff]  ;;  %v619_v5 = vld [vmem:[%s1689_s7 + $0x20] sm:$0xff] }
  0x17   :  { %90 = vperm.xlu0 %1160, %v59_v19   ;;  %85 = vperm.xlu1 %1161, %v58_v20   ;;  %v618_v6 = vld [vmem:[%s1689_s7 + $0x18] sm:$0xff]  ;;  %v508_v7 = vld [vmem:[%s1687_s6 + $0x8] sm:$0xff]  ;;  %v507_v8 = vld [vmem:[%s1687_s6] sm:$0xff] }
  0x18   :  { %1067 = vmatprep.subr.mxu0 %v1178_v0  ;;  %1096 = vmatprep.subr.mxu1 %v1178_v0  ;;  %v412_v9 = vld [vmem:[%s1688_s5] sm:$0xff]  ;;  %v616_v10 = vld [vmem:[%s1689_s7 + $0x8] sm:$0xff]  ;;  %v617_v11 = vld [vmem:[%s1689_s7 + $0x10] sm:$0xff] }
  0x19   :  { %1032 = vmatmul.mubr.msk.f32.gmra.mxu0 %vm133_vm2, %v43_v21  ;;  %1053 = vmatmul.mubr.msk.f32.gmra.mxu1 %vm133_vm2, %v50_v22  ;;  %v732_v12 = vld [vmem:[%s1690_s9 + $0x30] sm:$0x3]  ;;  %v615_v13 = vld [vmem:[%s1689_s7] sm:$0xff]  ;;  %v727_v14 = vld [vmem:[%s1690_s9 + $0x8] sm:$0xff] }
  0x1a   :  { %1034 = vmatprep.mubr.msk.f32.mxu0 %vm1180_vm1, %v1178_v0  ;;  %1055 = vmatprep.mubr.msk.f32.mxu1 %vm1180_vm1, %v1178_v0  ;;  %v726_v15 = vld [vmem:[%s1690_s9] sm:$0xff]  ;;  %v729_v16 = vld [vmem:[%s1690_s9 + $0x18] sm:$0xff]  ;;  %v728_v17 = vld [vmem:[%s1690_s9 + $0x10] sm:$0xff] }
  0x1b   :  { %80 = vperm.xlu0 %1160, %v57_v23   ;;  %75 = vperm.xlu1 %1161, %v56_v24   ;;  %v731_v18 = vld [vmem:[%s1690_s9 + $0x28] sm:$0xff]  ;;  %v730_v19 = vld [vmem:[%s1690_s9 + $0x20] sm:$0xff] }
  0x1d   :  { %1035 = vmatmul.mubr.msk.f32.gmra.mxu0 %vm133_vm2, %v44_v25  ;;  %1056 = vmatmul.mubr.msk.f32.gmra.mxu1 %vm133_vm2, %v51_v26 }
  0x1e   :  { %1037 = vmatprep.mubr.msk.f32.mxu0 %vm1180_vm1, %v1178_v0  ;;  %1058 = vmatprep.mubr.msk.f32.mxu1 %vm1180_vm1, %v1178_v0 }
  0x1f   :  { %324 = vperm.xlu1 %1161, %v321_v27   ;;  %70 = vperm.xlu0 %1160, %v55_v28  }
  0x21   :  { %1038 = vmatmul.mubr.msk.f32.gmra.mxu0 %vm133_vm2, %v45_v29  ;;  %1059 = vmatmul.mubr.msk.f32.gmra.mxu1 %vm133_vm2, %v52_v30 }
  0x22   :  { %1040 = vmatprep.mubr.msk.f32.mxu0 %vm1180_vm1, %v1178_v0  ;;  %1061 = vmatprep.mubr.msk.f32.mxu1 %vm1180_vm1, %v1178_v0 }
  0x23   :  { %582 = vperm.xlu1 %1161, %v519_v31   ;;  %487 = vperm.xlu0 %1160, %v424_v32  }
  0x25   :  { %1041 = vmatmul.mubr.msk.f32.gmra.mxu0 %vm133_vm2, %v46_v33  ;;  %1062 = vmatmul.mubr.msk.f32.gmra.mxu1 %vm133_vm2, %v53_v34 }
  0x26   :  { %1043 = vmatprep.mubr.msk.f32.mxu0 %vm1180_vm1, %v1178_v0  ;;  %1064 = vmatprep.mubr.msk.f32.mxu1 %vm1180_vm1, %v1178_v0 }
  0x27   :  { %577 = vperm.xlu1 %1161, %v518_v35   ;;  %482 = vperm.xlu0 %1160, %v423_v36  }
  0x29   :  { %1044 = vmatmul.mubr.msk.f32.gmra.mxu0 %vm133_vm2, %v47_v37  ;;  %1065 = vmatmul.mubr.msk.f32.gmra.mxu1 %vm133_vm2, %v54_v38 }
  0x2a   :  { %1046 = vmatprep.mubr.msk.f32.mxu0 %vm1180_vm1, %v1178_v0  ;;  %1122 = vmatprep.mubr.msk.f32.mxu1 %vm1180_vm1, %v1178_v0 }
  0x2b   :  { %572 = vperm.xlu1 %1161, %v517_v39   ;;  %477 = vperm.xlu0 %1160, %v422_v40  }
  0x2d   :  { %1047 = vmatmul.mubr.msk.f32.gmra.mxu0 %vm133_vm2, %v48_v41 }
  0x2e   :  { %1093 = vmatprep.mubr.msk.f32.mxu0 %vm1180_vm1, %v1178_v0 }
  0x2f   :  { %472 = vperm.xlu1 %1161, %v421_v42   ;;  %690 = vperm.xlu0 %1160, %v627_v43  }
  0x33   :  { %685 = vperm.xlu1 %1161, %v626_v44   ;;  %567 = vperm.xlu0 %1160, %v516_v45  }
  0x37   :  { %562 = vperm.xlu1 %1161, %v515_v46   ;;  %467 = vperm.xlu0 %1160, %v420_v47  }
  0x3b   :  { %462 = vperm.xlu1 %1161, %v419_v48   ;;  %680 = vperm.xlu0 %1160, %v625_v49  }
  0x3f   :  { %675 = vperm.xlu1 %1161, %v624_v50   ;;  %557 = vperm.xlu0 %1160, %v514_v51  }
  0x43   :  { %552 = vperm.xlu1 %1161, %v513_v52   ;;  %457 = vperm.xlu0 %1160, %v418_v53  }
  0x47   :  { %452 = vperm.xlu1 %1161, %v417_v54   ;;  %670 = vperm.xlu0 %1160, %v623_v55  }
  0x4b   :  { %665 = vperm.xlu1 %1161, %v622_v56   ;;  %547 = vperm.xlu0 %1160, %v512_v57  }
  0x4f   :  { %542 = vperm.xlu1 %1161, %v511_v58   ;;  %447 = vperm.xlu0 %1160, %v416_v59  }
  0x53   :  { %442 = vperm.xlu1 %1161, %v415_v60   ;;  %660 = vperm.xlu0 %1160, %v621_v61  }
  0x57   :  { %655 = vperm.xlu1 %1161, %v620_v62   ;;  %537 = vperm.xlu0 %1160, %v510_v63  }
  0x5b   :  { %532 = vperm.xlu1 %1161, %v509_v1   ;;  %437 = vperm.xlu0 %1160, %v414_v2  }
  0x5f   :  { %432 = vperm.xlu1 %1161, %v413_v4   ;;  %650 = vperm.xlu0 %1160, %v619_v5  }
  0x63   :  { %645 = vperm.xlu1 %1161, %v618_v6   ;;  %527 = vperm.xlu0 %1160, %v508_v7  }
  0x67   :  { %522 = vperm.xlu1 %1161, %v507_v8   ;;  %427 = vperm.xlu0 %1160, %v412_v9  }
  0x6b   :  { %635 = vperm.xlu1 %1161, %v616_v10   ;;  %640 = vperm.xlu0 %1160, %v617_v11  }
  0x6f   :  { %765 = vperm.xlu1 %1161, %v732_v12   ;;  %630 = vperm.xlu0 %1160, %v615_v13  }
  0x73   :  { %740 = vperm.xlu1 %1161, %v727_v14   ;;  %735 = vperm.xlu0 %1160, %v726_v15  }
  0x77   :  { %750 = vperm.xlu1 %1161, %v729_v16   ;;  %745 = vperm.xlu0 %1160, %v728_v17  }
  0x7b   :  { %760 = vperm.xlu1 %1161, %v731_v18   ;;  %755 = vperm.xlu0 %1160, %v730_v19  }
  0x7e   :  { %v131_v26 = vpop.permute.xlu0 %130  ;;  %v121_v31 = vpop.permute.xlu1 %120 }
  0x83   :  { %v126_v34 = vpop.permute.xlu0 %125  ;;  %v116_v39 = vpop.permute.xlu1 %115 }
  0x88   :  { %v111_v42 = vpop.permute.xlu0 %110  ;;  %v106_v47 = vpop.permute.xlu1 %105 }
  0x8e   :  { %v101_v54 = vpop.permute.xlu0 %100  ;;  %v96_v61 = vpop.permute.xlu1 %95 }
  0x92   :  { %v91_v1 = vpop.permute.xlu0 %90  ;;  %v86_v7 = vpop.permute.xlu1 %85 }
  0x96   :  { %v81_v10 = vpop.permute.xlu0 %80  ;;  %v76_v15 = vpop.permute.xlu1 %75 }
  0x9a   :  { %v71_v18 = vpop.permute.xlu0 %70 }
  0xd5   :  { %v1541_v20 = vpop.f32.mrf.mxu0  ;;  %v278_v21 = vpop.f32.mrf.mxu1 }
  0xd6   :  { %v279_v62 = vadd.f32 %v278_v21, %v106_v47  ;;  %v244_v19 = vadd.f32 %v1541_v20, %v71_v18  ;;  %v325_v20 = vpop.permute.xlu1 %324 }
  0xd7   :  { %v1030_v22 = vpop.f32.mrf.mxu0  ;;  %v1051_v23 = vpop.f32.mrf.mxu1 }
  0xd8   :  { %v314_v5 = vmax.f32 %v279_v62, 0.0  ;;  %v307_v23 = vmax.f32 %v244_v19, 0.0 }
  0xd9   :  { %v1543_v24 = vpop.f32.mrf.mxu0  ;;  %v283_v25 = vpop.f32.mrf.mxu1 }
  0xda   :  { %v284_v59 = vadd.f32 %v283_v25, %v111_v42  ;;  %v249_v16 = vadd.f32 %v1543_v24, %v76_v15  ;;  %v320_v24 = vld [vmem:[%s1691_s3] sm:$0xf]  ;;  %v488_v25 = vpop.permute.xlu0 %487 }
  0xdb   :  { %v1033_v27 = vpop.f32.mrf.mxu0  ;;  %v1054_v28 = vpop.f32.mrf.mxu1 }
  0xdc   :  { %v315_v2 = vmax.f32 %v284_v59, 0.0  ;;  %v308_v22 = vmax.f32 %v249_v16, 0.0 }
  0xdd   :  { %v253_v29 = vpop.f32.mrf.mxu0  ;;  %v288_v30 = vpop.f32.mrf.mxu1 }
  0xde   :  { %v289_v56 = vadd.f32 %v288_v30, %v116_v39  ;;  %v254_v13 = vadd.f32 %v253_v29, %v81_v10  ;;  %v483_v27 = vpop.permute.xlu0 %482 }
  0xdf   :  { %v1036_v32 = vpop.f32.mrf.mxu0  ;;  %v1057_v33 = vpop.f32.mrf.mxu1 }
  0xe0   :  { %v316_v63 = vmax.f32 %v289_v56, 0.0  ;;  %v309_v21 = vmax.f32 %v254_v13, 0.0 }
  0xe1   :  { %v258_v35 = vpop.f32.mrf.mxu0  ;;  %v293_v36 = vpop.f32.mrf.mxu1 }
  0xe2   :  { %v294_v52 = vadd.f32 %v293_v36, %v121_v31  ;;  %v259_v11 = vadd.f32 %v258_v35, %v86_v7  ;;  %v478_v29 = vpop.permute.xlu0 %477 }
  0xe3   :  { %v1039_v37 = vpop.f32.mrf.mxu0  ;;  %v1060_v38 = vpop.f32.mrf.mxu1 }
  0xe4   :  { %v317_v60 = vmax.f32 %v294_v52, 0.0  ;;  %v310_v17 = vmax.f32 %v259_v11, 0.0 }
  0xe5   :  { %v263_v40 = vpop.f32.mrf.mxu0  ;;  %v298_v41 = vpop.f32.mrf.mxu1 }
  0xe6   :  { %v299_v48 = vadd.f32 %v298_v41, %v126_v34  ;;  %v264_v8 = vadd.f32 %v263_v40, %v91_v1  ;;  %v691_v31 = vpop.permute.xlu0 %690 }
  0xe7   :  { %v1042_v43 = vpop.f32.mrf.mxu0  ;;  %v1063_v44 = vpop.f32.mrf.mxu1 }
  0xe8   :  { %v318_v57 = vmax.f32 %v299_v48, 0.0  ;;  %v311_v14 = vmax.f32 %v264_v8, 0.0 }
  0xe9   :  { %v268_v45 = vpop.f32.mrf.mxu0  ;;  %v303_v46 = vpop.f32.mrf.mxu1 }
  0xea   :  { %v304_v49 = vadd.f32 %v303_v46, %v131_v26  ;;  %v269_v6 = vadd.f32 %v268_v45, %v96_v61  ;;  %v583_v26 = vpop.permute.xlu1 %582  ;;  %v568_v33 = vpop.permute.xlu0 %567 }
  0xeb   :  { %v1045_v50 = vpop.f32.mrf.mxu0  ;;  %v1066_v51 = vpop.f32.mrf.mxu1 }
  0xec   :  { %v319_v53 = vmax.f32 %v304_v49, 0.0  ;;  %v312_v12 = vmax.f32 %v269_v6, 0.0 }
  0xed   :  { %v273_v55 = vpop.f32.mrf.mxu0 }
  0xee   :  { %1068 = vmatpush3.msk.msra.mxu0 %vm173_vm0, %v319_v53  ;;  %v274_v4 = vadd.f32 %v273_v55, %v101_v54  ;;  %v578_v28 = vpop.permute.xlu1 %577  ;;  %v468_v35 = vpop.permute.xlu0 %467  ;;  %v490_v55 = vlaneseq }
  0xef   :  { %1069 = vmatprep.subr.mxu0 %v1178_v0  ;;  %v1048_v58 = vpop.f32.mrf.mxu0 }
  0xf0   :  { %1070 = vmatpush3.msra.mxu0 %v318_v57  ;;  %v313_v9 = vmax.f32 %v274_v4, 0.0  ;;  %v491_v58 = vshrl.u32 %v490_v55, 7 }
  0xf1   :  { %1071 = vmatprep.subr.mxu0 %v1178_v0 }
  0xf2   :  { %1072 = vmatpush3.msra.mxu0 %v317_v60  ;;  %v573_v30 = vpop.permute.xlu1 %572  ;;  %v681_v37 = vpop.permute.xlu0 %680  ;;  %v587_v1 = vsub.s32 1, %v491_v58 }
  0xf3   :  { %1073 = vmatprep.subr.mxu0 %v1178_v0 }
  0xf4   :  { %1074 = vmatpush3.msra.mxu0 %v316_v63  ;;  %v492_v63 = vsub.s32 0, %v491_v58 }
  0xf5   :  { %1075 = vmatprep.subr.mxu0 %v1178_v0 }
  0xf6   :  { %1076 = vmatpush3.msra.mxu0 %v315_v2  ;;  %v473_v32 = vpop.permute.xlu1 %472  ;;  %v558_v39 = vpop.permute.xlu0 %557 }
  0xf7   :  { %1077 = vmatprep.subr.mxu0 %v1178_v0 }
  0xf8   :  { %1078 = vmatpush3.msra.mxu0 %v314_v5 }
  0xf9   :  { %1079 = vmatprep.subr.mxu0 %v1178_v0 }
  0xfa   :  { %1080 = vmatpush3.msra.mxu0 %v313_v9  ;;  %v686_v34 = vpop.permute.xlu1 %685  ;;  %v458_v41 = vpop.permute.xlu0 %457 }
  0xfb   :  { %1081 = vmatprep.subr.mxu0 %v1178_v0 }
  0xfc   :  { %1082 = vmatpush3.msra.mxu0 %v312_v12 }
  0xfd   :  { %1083 = vmatprep.subr.mxu0 %v1178_v0 }
  0xfe   :  { %1084 = vmatpush3.msra.mxu0 %v311_v14  ;;  %v563_v36 = vpop.permute.xlu1 %562  ;;  %v1564_v43 = vpop.permute.xlu0 %670 }
  0xff   :  { %1085 = vmatprep.subr.mxu0 %v1178_v0 }
 0x100   :  { %1086 = vmatpush3.msra.mxu0 %v310_v17 }
 0x101   :  { %1087 = vmatprep.subr.mxu0 %v1178_v0 }
 0x102   :  { %1088 = vmatpush3.msra.mxu0 %v309_v21  ;;  %v463_v38 = vpop.permute.xlu1 %462  ;;  %v548_v45 = vpop.permute.xlu0 %547 }
 0x103   :  { %1089 = vmatprep.subr.mxu0 %v1178_v0 }
 0x104   :  { %1090 = vmatpush3.msra.mxu0 %v308_v22 }
 0x105   :  { %1091 = vmatprep.subr.mxu0 %v1178_v0 }
 0x106   :  { %1092 = vmatpush3.msra.mxu0 %v307_v23  ;;  %v676_v40 = vpop.permute.xlu1 %675  ;;  %v448_v52 = vpop.permute.xlu0 %447 }
 0x107   :  { %1094 = vmatmul.mubr.msk.f32.vlgmr.msra.gmra.mxu0 %vm327_vm3, %v320_v24 }
 0x10a   :  { %v553_v42 = vpop.permute.xlu1 %552  ;;  %v1569_v54 = vpop.permute.xlu0 %660 }
 0x10e   :  { %v453_v44 = vpop.permute.xlu1 %452  ;;  %v538_v57 = vpop.permute.xlu0 %537 }
 0x112   :  { %v666_v50 = vpop.permute.xlu1 %665  ;;  %v438_v2 = vpop.permute.xlu0 %437 }
 0x116   :  { %v543_v53 = vpop.permute.xlu1 %542  ;;  %v651_v11 = vpop.permute.xlu0 %650 }
 0x11a   :  { %v443_v56 = vpop.permute.xlu1 %442 }
 0x11e   :  { %v1572_v61 = vpop.permute.xlu1 %655 }
 0x122   :  { %v533_v7 = vpop.permute.xlu1 %532 }
 0x1c7   :  { %v400_v46 = vpop.f32.mrf.mxu0 }
 0x1c8   :  { %v1566_v47 = vadd.f32 %v400_v46, %v325_v20 }
 0x1c9   :  { %v1095_v48 = vpop.f32.mrf.mxu0 }
 0x1ca   :  { %v404_v49 = vmul.f32 0.5, %v1566_v47 }
 0x1cc   :  { %v405_v51 = vmul.f32 1.442695, %v404_v49 }
 0x1ce   :  { %1162 = vpow2.f32 %v405_v51 }
 0x1db   :  { %v1163_v59 = vpop.eup %1162 }
 0x1dc   :  { %v407_v60 = vmul.f32 %v1163_v59, %v1247_v3 }
 0x1de   :  { %v409_v62 = vrot.slane %v407_v60, 2 }
 0x1e0   :  { %v411_v4 = vadd.f32 %v409_v62, %v1566_v47 }
 0x1e2   :  { %v1575_v5 = vrot.slane %v411_v4, %v492_v63  ;;  %v1577_v6 = vrot.slane %v411_v4, %v587_v1 }
 0x1e4   :  { %v506_v8 = vmul.f32 %v1575_v5, %v488_v25  ;;  %v601_v9 = vmul.f32 %v1577_v6, %v583_v26  ;;  %v505_v10 = vmul.f32 %v1575_v5, %v483_v27  ;;  %v600_v3 = vmul.f32 %v1577_v6, %v578_v28  ;;  %v433_v26 = vpop.permute.xlu1 %432 }
 0x1e5   :  { %v504_v12 = vmul.f32 %v1575_v5, %v478_v29  ;;  %v599_v13 = vmul.f32 %v1577_v6, %v573_v30  ;;  %v503_v14 = vmul.f32 %v1575_v5, %v473_v32  ;;  %v598_v15 = vmul.f32 %v1577_v6, %v568_v33  ;;  %v528_v33 = vpop.permute.xlu0 %527 }
 0x1e6   :  { %v614_v16 = vadd.f32 %v601_v9, %v506_v8  ;;  %v613_v17 = vadd.f32 %v600_v3, %v505_v10  ;;  %v502_v18 = vmul.f32 %v1575_v5, %v468_v35  ;;  %v597_v19 = vmul.f32 %v1577_v6, %v563_v36 }
 0x1e7   :  { %v612_v21 = vadd.f32 %v599_v13, %v504_v12  ;;  %v501_v22 = vmul.f32 %v1575_v5, %v463_v38  ;;  %v596_v23 = vmul.f32 %v1577_v6, %v558_v39  ;;  %v611_v25 = vadd.f32 %v598_v15, %v503_v14 }
 0x1e8   :  { %v705_v24 = vadd.f32 %v691_v31, %v614_v16  ;;  %v704_v20 = vadd.f32 %v686_v34, %v613_v17  ;;  %v500_v27 = vmul.f32 %v1575_v5, %v458_v41  ;;  %v595_v28 = vmul.f32 %v1577_v6, %v553_v42  ;;  %v646_v48 = vpop.permute.xlu1 %645 }
 0x1e9   :  { %v703_v30 = vadd.f32 %v681_v37, %v612_v21  ;;  %v610_v32 = vadd.f32 %v597_v19, %v502_v18  ;;  %v609_v35 = vadd.f32 %v596_v23, %v501_v22  ;;  %v702_v46 = vadd.f32 %v676_v40, %v611_v25  ;;  %v428_v55 = vpop.permute.xlu0 %427  ;;  %v719_v19 = vld [vmem:[%s1692_s8] sm:$0xff]  ;;  %v720_v21 = vld [vmem:[%s1692_s8 + $0x8] sm:$0xff]  ;;  %v721_v22 = vld [vmem:[%s1692_s8 + $0x10] sm:$0xff] }
 0x1ea   :  { %v718_v29 = vmax.f32 %v705_v24, 0.0  ;;  %v717_v36 = vmax.f32 %v704_v20, 0.0  ;;  %v499_v38 = vmul.f32 %v1575_v5, %v453_v44  ;;  %v594_v31 = vmul.f32 %v1577_v6, %v548_v45  ;;  %v722_v23 = vld [vmem:[%s1692_s8 + $0x18] sm:$0xff]  ;;  %v723_v24 = vld [vmem:[%s1692_s8 + $0x20] sm:$0xff]  ;;  %v724_v20 = vld [vmem:[%s1692_s8 + $0x28] sm:$0xff] }
 0x1eb   :  { %v608_v34 = vadd.f32 %v595_v28, %v500_v27  ;;  %v716_v39 = vmax.f32 %v703_v30, 0.0  ;;  %v701_v41 = vadd.f32 %v1564_v43, %v610_v32  ;;  %v498_v37 = vmul.f32 %v1575_v5, %v448_v52  ;;  %v725_v25 = vld [vmem:[%s1692_s8 + $0x30] sm:$0x3] }
 0x1ec   :  { %1097 = vmatpush3.msk.msra.mxu1 %vm173_vm0, %v718_v29  ;;  %v593_v42 = vmul.f32 %v1577_v6, %v543_v53  ;;  %v700_v49 = vadd.f32 %v666_v50, %v609_v35  ;;  %v715_v40 = vmax.f32 %v702_v46, 0.0  ;;  %v607_v44 = vadd.f32 %v594_v31, %v499_v38  ;;  %v523_v63 = vpop.permute.xlu1 %522 }
 0x1ed   :  { %1098 = vmatprep.subr.mxu1 %v1178_v0  ;;  %v497_v45 = vmul.f32 %v1575_v5, %v443_v56  ;;  %v592_v51 = vmul.f32 %v1577_v6, %v538_v57  ;;  %v699_v43 = vadd.f32 %v1569_v54, %v608_v34  ;;  %v714_v52 = vmax.f32 %v701_v41, 0.0  ;;  %v641_v8 = vpop.permute.xlu0 %640 }
 0x1ee   :  { %1099 = vmatpush3.msra.mxu1 %v717_v36  ;;  %v606_v58 = vadd.f32 %v593_v42, %v498_v37  ;;  %v496_v53 = vmul.f32 %v1575_v5, %v438_v2  ;;  %v591_v59 = vmul.f32 %v1577_v6, %v533_v7  ;;  %v713_v50 = vmax.f32 %v700_v49, 0.0 }
 0x1ef   :  { %1100 = vmatprep.subr.mxu1 %v1178_v0  ;;  %v698_v56 = vadd.f32 %v1572_v61, %v607_v44  ;;  %v605_v60 = vadd.f32 %v592_v51, %v497_v45  ;;  %v495_v57 = vmul.f32 %v1575_v5, %v433_v26  ;;  %v590_v62 = vmul.f32 %v1577_v6, %v528_v33 }
 0x1f0   :  { %1101 = vmatpush3.msra.mxu1 %v716_v39  ;;  %v712_v54 = vmax.f32 %v699_v43, 0.0  ;;  %v697_v1 = vadd.f32 %v651_v11, %v606_v58  ;;  %v604_v2 = vadd.f32 %v591_v59, %v496_v53  ;;  %v494_v4 = vmul.f32 %v1575_v5, %v428_v55  ;;  %v636_v14 = vpop.permute.xlu1 %635 }
 0x1f1   :  { %1102 = vmatprep.subr.mxu1 %v1178_v0  ;;  %v589_v7 = vmul.f32 %v1577_v6, %v523_v63  ;;  %v711_v61 = vmax.f32 %v698_v56, 0.0  ;;  %v696_v9 = vadd.f32 %v646_v48, %v605_v60  ;;  %v603_v10 = vadd.f32 %v590_v62, %v495_v57  ;;  %v631_v6 = vpop.permute.xlu0 %630 }
 0x1f2   :  { %1103 = vmatpush3.msra.mxu1 %v715_v40  ;;  %v710_v3 = vmax.f32 %v697_v1, 0.0  ;;  %v695_v12 = vadd.f32 %v641_v8, %v604_v2 }
 0x1f3   :  { %1104 = vmatprep.subr.mxu1 %v1178_v0  ;;  %v602_v13 = vadd.f32 %v589_v7, %v494_v4  ;;  %v709_v5 = vmax.f32 %v696_v9, 0.0  ;;  %v694_v11 = vadd.f32 %v636_v14, %v603_v10 }
 0x1f4   :  { %1105 = vmatpush3.msra.mxu1 %v714_v52  ;;  %v708_v15 = vmax.f32 %v695_v12, 0.0  ;;  %v766_v26 = vpop.permute.xlu1 %765 }
 0x1f5   :  { %1106 = vmatprep.subr.mxu1 %v1178_v0  ;;  %v693_v16 = vadd.f32 %v631_v6, %v602_v13  ;;  %v707_v17 = vmax.f32 %v694_v11, 0.0  ;;  %v736_v27 = vpop.permute.xlu0 %735 }
 0x1f6   :  { %1107 = vmatpush3.msra.mxu1 %v713_v50 }
 0x1f7   :  { %1108 = vmatprep.subr.mxu1 %v1178_v0  ;;  %v706_v18 = vmax.f32 %v693_v16, 0.0 }
 0x1f8   :  { %1109 = vmatpush3.msra.mxu1 %v712_v54  ;;  %v741_v33 = vpop.permute.xlu1 %740 }
 0x1f9   :  { %1110 = vmatprep.subr.mxu1 %v1178_v0  ;;  %v746_v31 = vpop.permute.xlu0 %745 }
 0x1fa   :  { %1111 = vmatpush3.msra.mxu1 %v711_v61 }
 0x1fb   :  { %1112 = vmatprep.subr.mxu1 %v1178_v0 }
 0x1fc   :  { %1113 = vmatpush3.msra.mxu1 %v710_v3  ;;  %v751_v37 = vpop.permute.xlu1 %750 }
 0x1fd   :  { %1114 = vmatprep.subr.mxu1 %v1178_v0  ;;  %v756_v44 = vpop.permute.xlu0 %755 }
 0x1fe   :  { %1115 = vmatpush3.msra.mxu1 %v709_v5 }
 0x1ff   :  { %1116 = vmatprep.subr.mxu1 %v1178_v0 }
 0x200   :  { %1117 = vmatpush3.msra.mxu1 %v708_v15  ;;  %v761_v53 = vpop.permute.xlu1 %760 }
 0x201   :  { %1118 = vmatprep.subr.mxu1 %v1178_v0 }
 0x202   :  { %1119 = vmatpush3.msra.mxu1 %v707_v17 }
 0x203   :  { %1120 = vmatprep.subr.mxu1 %v1178_v0 }
 0x204   :  { %1121 = vmatpush3.msra.mxu1 %v706_v18  ;;  %v921_v18 = vrot.slane %v1566_v47, 6 }
 0x205   :  { %1123 = vmatmul.mubr.msk.f32.vlgmr.msra.gmra.mxu1 %vm327_vm3, %v719_v19 }
 0x206   :  { %1125 = vmatprep.mubr.msk.f32.mxu1 %vm1180_vm1, %v1178_v0 }
 0x209   :  { %1126 = vmatmul.mubr.msk.f32.gmra.mxu1 %vm327_vm3, %v720_v21 }
 0x20a   :  { %1128 = vmatprep.mubr.msk.f32.mxu1 %vm1180_vm1, %v1178_v0 }
 0x20d   :  { %1129 = vmatmul.mubr.msk.f32.gmra.mxu1 %vm327_vm3, %v721_v22 }
 0x20e   :  { %1131 = vmatprep.mubr.msk.f32.mxu1 %vm1180_vm1, %v1178_v0 }
 0x211   :  { %1132 = vmatmul.mubr.msk.f32.gmra.mxu1 %vm327_vm3, %v722_v23 }
 0x212   :  { %1134 = vmatprep.mubr.msk.f32.mxu1 %vm1180_vm1, %v1178_v0 }
 0x215   :  { %1135 = vmatmul.mubr.msk.f32.gmra.mxu1 %vm327_vm3, %v723_v24 }
 0x216   :  { %1137 = vmatprep.mubr.msk.f32.mxu1 %vm1180_vm1, %v1178_v0 }
 0x219   :  { %1138 = vmatmul.mubr.msk.f32.gmra.mxu1 %vm327_vm3, %v724_v20 }
 0x21a   :  { %1140 = vmatprep.mubr.msk.f32.mxu1 %vm1180_vm1, %v1178_v0 }
 0x21d   :  { %1141 = vmatmul.mubr.msk.f32.gmra.mxu1 %vm327_vm3, %v725_v25 }
 0x2c5   :  { %v858_v28 = vpop.f32.mrf.mxu1 }
 0x2c6   :  { %v859_v29 = vadd.f32 %v858_v28, %v736_v27 }
 0x2c7   :  { %v1124_v30 = vpop.f32.mrf.mxu1 }
 0x2c8   :  { %v892_v32 = vmul.f32 0.5, %v859_v29 }
 0x2c9   :  { %v863_v35 = vpop.f32.mrf.mxu1 }
 0x2ca   :  { %1164 = vtanh.f32 %v892_v32  ;;  %v864_v36 = vadd.f32 %v863_v35, %v741_v33 }
 0x2cb   :  { %v1127_v46 = vpop.f32.mrf.mxu1 }
 0x2cc   :  { %v893_v38 = vmul.f32 0.5, %v864_v36 }
 0x2cd   :  { %v868_v0 = vpop.f32.mrf.mxu1 }
 0x2ce   :  { %1166 = vtanh.f32 %v893_v38  ;;  %v869_v34 = vadd.f32 %v868_v0, %v746_v31 }
 0x2cf   :  { %v1130_v39 = vpop.f32.mrf.mxu1 }
 0x2d0   :  { %v894_v41 = vmul.f32 0.5, %v869_v34 }
 0x2d1   :  { %v873_v42 = vpop.f32.mrf.mxu1 }
 0x2d2   :  { %1168 = vtanh.f32 %v894_v41  ;;  %v874_v48 = vadd.f32 %v873_v42, %v751_v37 }
 0x2d3   :  { %v1133_v49 = vpop.f32.mrf.mxu1 }
 0x2d4   :  { %v895_v40 = vmul.f32 0.5, %v874_v48 }
 0x2d5   :  { %v878_v45 = vpop.f32.mrf.mxu1 }
 0x2d6   :  { %1170 = vtanh.f32 %v895_v40  ;;  %v879_v51 = vadd.f32 %v878_v45, %v756_v44 }
 0x2d7   :  { %v1165_v55 = vpop.eup %1164  ;;  %v1136_v43 = vpop.f32.mrf.mxu1 }
 0x2d8   :  { %v906_v52 = vmul.f32 0.5, %v1165_v55  ;;  %v896_v58 = vmul.f32 0.5, %v879_v51 }
 0x2d9   :  { %v883_v59 = vpop.f32.mrf.mxu1 }
 0x2da   :  { %v913_v50 = vadd.f32 0.5, %v906_v52  ;;  %1172 = vtanh.f32 %v896_v58  ;;  %v884_v56 = vadd.f32 %v883_v59, %v761_v53 }
 0x2db   :  { %v1167_v60 = vpop.eup %1166  ;;  %v1139_v57 = vpop.f32.mrf.mxu1 }
 0x2dc   :  { %925 = vst [vmem:[%s1693_s10] sm:$0xff] %v913_v50  ;;  %v907_v62 = vmul.f32 0.5, %v1167_v60  ;;  %v897_v63 = vmul.f32 0.5, %v884_v56 }
 0x2dd   :  { %v888_v54 = vpop.f32.mrf.mxu1 }
 0x2de   :  { %v914_v1 = vadd.f32 0.5, %v907_v62  ;;  %1174 = vtanh.f32 %v897_v63  ;;  %v889_v2 = vadd.f32 %v888_v54, %v766_v26 }
 0x2df   :  { %v1169_v4 = vpop.eup %1168  ;;  %v1142_v7 = vpop.f32.mrf.mxu1 }
 0x2e0   :  { %926 = vst [vmem:[%s1693_s10 + $0x8] sm:$0xff] %v914_v1  ;;  %v908_v8 = vmul.f32 0.5, %v1169_v4  ;;  %v898_v61 = vmul.f32 0.5, %v889_v2 }
 0x2e2   :  { %v915_v9 = vadd.f32 0.5, %v908_v8  ;;  %1176 = vtanh.f32 %v898_v61 }
 0x2e3   :  { %v1171_v10 = vpop.eup %1170 }
 0x2e4   :  { %927 = vst [vmem:[%s1693_s10 + $0x10] sm:$0xff] %v915_v9  ;;  %v909_v3 = vmul.f32 0.5, %v1171_v10 }
 0x2e6   :  { %v916_v12 = vadd.f32 0.5, %v909_v3 }
 0x2e7   :  { %v1173_v13 = vpop.eup %1172 }
 0x2e8   :  { %928 = vst [vmem:[%s1693_s10 + $0x18] sm:$0xff] %v916_v12  ;;  %v910_v14 = vmul.f32 0.5, %v1173_v13 }
 0x2ea   :  { %v917_v5 = vadd.f32 0.5, %v910_v14 }
 0x2eb   :  { %v1175_v11 = vpop.eup %1174 }
 0x2ec   :  { %929 = vst [vmem:[%s1693_s10 + $0x20] sm:$0xff] %v917_v5  ;;  %v911_v6 = vmul.f32 0.5, %v1175_v11 }
 0x2ee   :  { %v918_v15 = vadd.f32 0.5, %v911_v6 }
 0x2ef   :  { %v1177_v16 = vpop.eup %1176 }
 0x2f0   :  { %930 = vst [vmem:[%s1693_s10 + $0x28] sm:$0xff] %v918_v15  ;;  %v912_v17 = vmul.f32 0.5, %v1177_v16 }
 0x2f2   :  { %v919_v19 = vadd.f32 0.5, %v912_v17 }
 0x2f4   :  { %v924_v21 = vsel %vm923_vm4, %v919_v19, %v921_v18 }
 0x2f5   :  { %931 = vst [vmem:[%s1693_s10 + $0x30] sm:$0x3f] %v924_v21 }

</bundles_post_ra>
